<compile_context>
chip_gen: v6e
topology: v6e:2x2x1
jax: 0.10.0
libtpu: 0.0.40
codegen_flags: <defaults>
</compile_context>

<pallas_src>
import jax
import jax.numpy as jnp
from jax.experimental import pallas as pl
from jax.experimental.pallas import tpu as pltpu

BN_EPS = 1e-5
HID = 100        # true hidden width
HID_PAD = 128    # lane-dense hidden width (zero-padded)
OUT_PAD = 128    # lane-dense fc3 output width (true logits live in [:, :2])


def _netd_dc_kernel(x_ref, w1_ref, b1_ref, w2_ref, b2_ref, w3_ref, b3_ref, o_ref):
    # ---- fc1 (BN1 folded) + relu;  bf16 x bf16 -> f32 accumulate on the MXU ----
    h = jnp.dot(x_ref[...], w1_ref[...], preferred_element_type=jnp.float32)
    h = jnp.maximum(h + b1_ref[...], 0.0)            # dropout(eval) = identity
    h = h.astype(jnp.bfloat16)                        # (TM, 128), padded lanes 0

    # ---- fc2 (BN2 folded) + relu ----
    h = jnp.dot(h, w2_ref[...], preferred_element_type=jnp.float32)
    h = jnp.maximum(h + b2_ref[...], 0.0)             # dropout(eval) = identity
    h = h.astype(jnp.bfloat16)

    # ---- fc3 (lane-dense; columns 2..127 and rows 100..127 are zero) ----
    o = jnp.dot(h, w3_ref[...], preferred_element_type=jnp.float32) + b3_ref[...]
    o_ref[...] = o.astype(o_ref.dtype)                # bf16 output slab


def fold_params(p):
    """Fold eval-mode BN into fc1/fc2, zero-pad to lane-dense widths, cast to bf16."""
    s1 = p["g1"] * jax.lax.rsqrt(p["v1"] + BN_EPS)            # (1, 100)
    w1 = p["w1"] * s1                                          # (2048, 100)
    b1 = (p["b1"] - p["m1"]) * s1 + p["be1"]                  # (1, 100)

    s2 = p["g2"] * jax.lax.rsqrt(p["v2"] + BN_EPS)
    w2 = p["w2"] * s2                                          # (100, 100)
    b2 = (p["b2"] - p["m2"]) * s2 + p["be2"]                  # (1, 100)

    # Zero padding keeps results bit-exact: padded h lanes are relu(0)=0 and
    # multiply zero rows of w2/w3.
    w1p = jnp.zeros((2048, HID_PAD), jnp.float32).at[:, :HID].set(w1).astype(jnp.bfloat16)
    b1p = jnp.zeros((1, HID_PAD), jnp.float32).at[:, :HID].set(b1)
    w2p = jnp.zeros((HID_PAD, HID_PAD), jnp.float32).at[:HID, :HID].set(w2).astype(jnp.bfloat16)
    b2p = jnp.zeros((1, HID_PAD), jnp.float32).at[:, :HID].set(b2)
    w3p = jnp.zeros((HID_PAD, OUT_PAD), jnp.float32).at[:HID, :2].set(p["w3"]).astype(jnp.bfloat16)
    b3p = jnp.zeros((1, OUT_PAD), jnp.float32).at[:, :2].set(p["b3"])
    return w1p, b1p, w2p, b2p, w3p, b3p


def netd_dc_forward(x, folded, *, tm=2048):
    """x: (N, 2048) bfloat16 (producer should emit bf16). Returns (N, 2) f32 logits."""
    n, k = x.shape
    assert k == 2048, k
    assert x.dtype == jnp.bfloat16, x.dtype
    w1, b1, w2, b2, w3, b3 = folded

    # Batch tile: multiple of 8 sublanes, no over-padding of tiny batches, and
    # capped so the grid has >= 2 steps when the batch allows (v7x has 2
    # TensorCores; the "parallel" axis only shards across them with >= 2 steps).
    tm = min(tm, max(8, ((n + 7) // 8) * 8))
    tm = min(tm, ((pl.cdiv(n, 2) + 7) // 8) * 8)
    n_pad = pl.cdiv(n, tm) * tm
    if n_pad != n:
        x = jnp.pad(x, ((0, n_pad - n), (0, 0)))

    grid = (n_pad // tm,)
    const = lambda i: (0, 0)  # weights/biases resident in VMEM across grid steps

    out = pl.pallas_call(
        _netd_dc_kernel,
        out_shape=jax.ShapeDtypeStruct((n_pad, OUT_PAD), jnp.bfloat16),
        grid=grid,
        in_specs=[
            pl.BlockSpec((tm, 2048), lambda i: (i, 0)),        # x streamed (bf16)
            pl.BlockSpec((2048, HID_PAD), const),              # w1 (bf16, BN1 folded)
            pl.BlockSpec((1, HID_PAD), const),                 # b1 (f32, BN1 folded)
            pl.BlockSpec((HID_PAD, HID_PAD), const),           # w2 (bf16, BN2 folded)
            pl.BlockSpec((1, HID_PAD), const),                 # b2 (f32, BN2 folded)
            pl.BlockSpec((HID_PAD, OUT_PAD), const),           # w3 (bf16, lane padded)
            pl.BlockSpec((1, OUT_PAD), const),                 # b3 (f32, lane padded)
        ],
        out_specs=pl.BlockSpec((tm, OUT_PAD), lambda i: (i, 0)),
        compiler_params=pltpu.CompilerParams(
            dimension_semantics=("parallel",),
            # TM=2048 bf16 x => ~20 MiB incl. double buffering; 32 MiB is within
            # every generation's physical VMEM and above v5e's 16 MiB default.
            vmem_limit_bytes=32 * 1024 * 1024,
        ),
    )(x, w1, b1, w2, b2, w3, b3)

    return out[:n, :2].astype(jnp.float32)


def init_params(key):
    """Deterministic synthetic parameters matching netD_dc.__init__ shapes."""
    ks = jax.random.split(key, 8)

    def u(k, shape, scale):
        return jax.random.uniform(k, shape, jnp.float32, -scale, scale)

    # Linear weights stored as (in, out) == PyTorch weight.T
    p = {
        "w1": u(ks[0], (2048, 100), 1.0 / (2048 ** 0.5)),
        "b1": u(ks[1], (1, 100), 1.0 / (2048 ** 0.5)),
        "w2": u(ks[2], (100, 100), 1.0 / (100 ** 0.5)),
        "b2": u(ks[3], (1, 100), 1.0 / (100 ** 0.5)),
        "w3": u(ks[4], (100, 2), 1.0 / (100 ** 0.5)),
        "b3": u(ks[5], (1, 2), 1.0 / (100 ** 0.5)),
        # BatchNorm1d(100): gamma, beta, running_mean, running_var
        "g1": jnp.ones((1, 100), jnp.float32) + 0.1 * jax.random.normal(ks[6], (1, 100)),
        "be1": 0.1 * jax.random.normal(ks[7], (1, 100)),
        "m1": 0.05 * jnp.arange(100, dtype=jnp.float32).reshape(1, 100) / 100.0,
        "v1": jnp.ones((1, 100), jnp.float32) * 1.5,
        "g2": jnp.ones((1, 100), jnp.float32) * 0.9,
        "be2": jnp.full((1, 100), 0.05, jnp.float32),
        "m2": jnp.full((1, 100), -0.02, jnp.float32),
        "v2": jnp.ones((1, 100), jnp.float32) * 0.8,
    }
    return p


def reference_forward(x, p):
    """Plain-JAX f32 reference with unfolded BN (eval-mode PyTorch semantics)."""
    h = x @ p["w1"] + p["b1"]
    h = (h - p["m1"]) / jnp.sqrt(p["v1"] + BN_EPS) * p["g1"] + p["be1"]
    h = jnp.maximum(h, 0.0)
    h = h @ p["w2"] + p["b2"]
    h = (h - p["m2"]) / jnp.sqrt(p["v2"] + BN_EPS) * p["g2"] + p["be2"]
    h = jnp.maximum(h, 0.0)
    return h @ p["w3"] + p["b3"]


if __name__ == "__main__":
    key = jax.random.PRNGKey(0)
    kx, kp = jax.random.split(key)

    N = 16  # batch of ROI-pooled feature vectors (small; exercises grid=(2,))
    # Upstream producer emits bf16 features directly (no standalone cast op).
    x = jax.random.normal(kx, (N, 2048), jnp.bfloat16)
    params = init_params(kp)
    folded = fold_params(params)

    out = netd_dc_forward(x, folded)
    out = jax.block_until_ready(out)

    # f32 reference sees the same (bf16-valued) inputs, upcast to f32.
    ref = reference_forward(x.astype(jnp.float32), params)
    assert out.shape == (N, 2), out.shape
    # fc1/fc2/fc3 run with bf16 operands (f32 accumulate) and the output slab
    # is bf16; tolerance sized for bf16 noise over K=2048.
    err = float(jnp.max(jnp.abs(out - ref)))
    assert jnp.allclose(out, ref, atol=5e-2, rtol=5e-2), err
    print("KERNEL_OK")
</pallas_src>

<mosaic_0001>
module attributes {stable_mosaic.version = 11 : i64} {
  func.func @_netd_dc_kernel(%arg0: i32, %arg1: memref<8x2048xbf16, #tpu.memory_space<vmem>>, %arg2: memref<2048x128xbf16, #tpu.memory_space<vmem>>, %arg3: memref<1x128xf32, #tpu.memory_space<vmem>>, %arg4: memref<128x128xbf16, #tpu.memory_space<vmem>>, %arg5: memref<1x128xf32, #tpu.memory_space<vmem>>, %arg6: memref<128x128xbf16, #tpu.memory_space<vmem>>, %arg7: memref<1x128xf32, #tpu.memory_space<vmem>>, %arg8: memref<8x128xbf16, #tpu.memory_space<vmem>>) attributes {dimension_semantics = [#tpu.dimension_semantics<parallel>], iteration_bounds = array<i64: 2>, scalar_prefetch = 0 : i64, scratch_operands = 0 : i64, tpu.core_type = #tpu.core_type<tc>, window_params = [{transform_indices = @transform_0, window_bounds = array<i64: 8, 2048>}, {pipeline_mode = #tpu.pipeline_mode<synchronous>, transform_indices = @transform_1, window_bounds = array<i64: 2048, 128>}, {pipeline_mode = #tpu.pipeline_mode<synchronous>, transform_indices = @transform_2, window_bounds = array<i64: 1, 128>}, {pipeline_mode = #tpu.pipeline_mode<synchronous>, transform_indices = @transform_3, window_bounds = array<i64: 128, 128>}, {pipeline_mode = #tpu.pipeline_mode<synchronous>, transform_indices = @transform_4, window_bounds = array<i64: 1, 128>}, {pipeline_mode = #tpu.pipeline_mode<synchronous>, transform_indices = @transform_5, window_bounds = array<i64: 128, 128>}, {pipeline_mode = #tpu.pipeline_mode<synchronous>, transform_indices = @transform_6, window_bounds = array<i64: 1, 128>}, {transform_indices = @transform_7, window_bounds = array<i64: 8, 128>}]} {
    %c0 = arith.constant 0 : index
    %c0_0 = arith.constant 0 : index
    %0 = vector.load %arg1[%c0, %c0_0] : memref<8x2048xbf16, #tpu.memory_space<vmem>>, vector<8x2048xbf16>
    %c0_1 = arith.constant 0 : index
    %c0_2 = arith.constant 0 : index
    %1 = vector.load %arg2[%c0_1, %c0_2] : memref<2048x128xbf16, #tpu.memory_space<vmem>>, vector<2048x128xbf16>
    %cst = arith.constant dense<0.000000e+00> : vector<8x128xf32>
    %2 = tpu.matmul %0, %1, %cst {dimension_numbers = #tpu.dot_dimension_numbers<[1], [0], [0], [1], [0, 0, 1, 1], [], []>} : vector<8x2048xbf16>, vector<2048x128xbf16>, vector<8x128xf32> -> vector<8x128xf32>
    %c0_3 = arith.constant 0 : index
    %c0_4 = arith.constant 0 : index
    %3 = vector.load %arg3[%c0_3, %c0_4] : memref<1x128xf32, #tpu.memory_space<vmem>>, vector<1x128xf32>
    %4 = vector.broadcast %3 : vector<1x128xf32> to vector<8x128xf32>
    %5 = arith.addf %2, %4 : vector<8x128xf32>
    %cst_5 = arith.constant 0.000000e+00 : f32
    %6 = vector.broadcast %cst_5 : f32 to vector<8x128xf32>
    %7 = arith.maximumf %5, %6 : vector<8x128xf32>
    %8 = arith.truncf %7 : vector<8x128xf32> to vector<8x128xbf16>
    %c0_6 = arith.constant 0 : index
    %c0_7 = arith.constant 0 : index
    %9 = vector.load %arg4[%c0_6, %c0_7] : memref<128x128xbf16, #tpu.memory_space<vmem>>, vector<128x128xbf16>
    %cst_8 = arith.constant dense<0.000000e+00> : vector<8x128xf32>
    %10 = tpu.matmul %8, %9, %cst_8 {dimension_numbers = #tpu.dot_dimension_numbers<[1], [0], [0], [1], [0, 0, 1, 1], [], []>} : vector<8x128xbf16>, vector<128x128xbf16>, vector<8x128xf32> -> vector<8x128xf32>
    %c0_9 = arith.constant 0 : index
    %c0_10 = arith.constant 0 : index
    %11 = vector.load %arg5[%c0_9, %c0_10] : memref<1x128xf32, #tpu.memory_space<vmem>>, vector<1x128xf32>
    %12 = vector.broadcast %11 : vector<1x128xf32> to vector<8x128xf32>
    %13 = arith.addf %10, %12 : vector<8x128xf32>
    %cst_11 = arith.constant 0.000000e+00 : f32
    %14 = vector.broadcast %cst_11 : f32 to vector<8x128xf32>
    %15 = arith.maximumf %13, %14 : vector<8x128xf32>
    %16 = arith.truncf %15 : vector<8x128xf32> to vector<8x128xbf16>
    %c0_12 = arith.constant 0 : index
    %c0_13 = arith.constant 0 : index
    %17 = vector.load %arg6[%c0_12, %c0_13] : memref<128x128xbf16, #tpu.memory_space<vmem>>, vector<128x128xbf16>
    %cst_14 = arith.constant dense<0.000000e+00> : vector<8x128xf32>
    %18 = tpu.matmul %16, %17, %cst_14 {dimension_numbers = #tpu.dot_dimension_numbers<[1], [0], [0], [1], [0, 0, 1, 1], [], []>} : vector<8x128xbf16>, vector<128x128xbf16>, vector<8x128xf32> -> vector<8x128xf32>
    %c0_15 = arith.constant 0 : index
    %c0_16 = arith.constant 0 : index
    %19 = vector.load %arg7[%c0_15, %c0_16] : memref<1x128xf32, #tpu.memory_space<vmem>>, vector<1x128xf32>
    %20 = vector.broadcast %19 : vector<1x128xf32> to vector<8x128xf32>
    %21 = arith.addf %18, %20 : vector<8x128xf32>
    %22 = arith.truncf %21 : vector<8x128xf32> to vector<8x128xbf16>
    %c0_17 = arith.constant 0 : index
    %c0_18 = arith.constant 0 : index
    %23 = vector.load %arg8[%c0_17, %c0_18] : memref<8x128xbf16, #tpu.memory_space<vmem>>, vector<8x128xbf16>
    tpu.vector_store %arg8[%c0_17, %c0_18], %22 {strides = array<i32>} : memref<8x128xbf16, #tpu.memory_space<vmem>>, vector<8x128xbf16>,
    return
  }
  func.func @transform_0(%arg0: i32) -> (i32, i32) {
    %c0_i32 = arith.constant 0 : i32
    %c0_i32_0 = arith.constant 0 : i32
    return %arg0, %c0_i32 : i32, i32
  }
  func.func @transform_1(%arg0: i32) -> (i32, i32) {
    %c0_i32 = arith.constant 0 : i32
    %c0_i32_0 = arith.constant 0 : i32
    %c0_i32_1 = arith.constant 0 : i32
    return %c0_i32, %c0_i32_0 : i32, i32
  }
  func.func @transform_2(%arg0: i32) -> (i32, i32) {
    %c0_i32 = arith.constant 0 : i32
    %c0_i32_0 = arith.constant 0 : i32
    %c0_i32_1 = arith.constant 0 : i32
    return %c0_i32, %c0_i32_0 : i32, i32
  }
  func.func @transform_3(%arg0: i32) -> (i32, i32) {
    %c0_i32 = arith.constant 0 : i32
    %c0_i32_0 = arith.constant 0 : i32
    %c0_i32_1 = arith.constant 0 : i32
    return %c0_i32, %c0_i32_0 : i32, i32
  }
  func.func @transform_4(%arg0: i32) -> (i32, i32) {
    %c0_i32 = arith.constant 0 : i32
    %c0_i32_0 = arith.constant 0 : i32
    %c0_i32_1 = arith.constant 0 : i32
    return %c0_i32, %c0_i32_0 : i32, i32
  }
  func.func @transform_5(%arg0: i32) -> (i32, i32) {
    %c0_i32 = arith.constant 0 : i32
    %c0_i32_0 = arith.constant 0 : i32
    %c0_i32_1 = arith.constant 0 : i32
    return %c0_i32, %c0_i32_0 : i32, i32
  }
  func.func @transform_6(%arg0: i32) -> (i32, i32) {
    %c0_i32 = arith.constant 0 : i32
    %c0_i32_0 = arith.constant 0 : i32
    %c0_i32_1 = arith.constant 0 : i32
    return %c0_i32, %c0_i32_0 : i32, i32
  }
  func.func @transform_7(%arg0: i32) -> (i32, i32) {
    %c0_i32 = arith.constant 0 : i32
    %c0_i32_0 = arith.constant 0 : i32
    return %arg0, %c0_i32 : i32, i32
  }
}

</mosaic_0001>

<bundles_post_ra>
// kernel: tpu_custom_call.1
= control target key start
LH: loop header
LB: loop body
LE: loop exit
PB: predicated region body
PF: predicated region fallthrough
CT: control target
= control target key end

     0   :  { %s3210_s0 = inlined_call_operand.hbm [shape: bf16[16,2048], index: 0, kind: input, shape index: {}]   ;;  %s3211_s1 = inlined_call_operand.hbm [shape: bf16[2048,128], index: 1, kind: input, shape index: {}]   ;;  %s3212_s2 = inlined_call_operand.vmem [shape: f32[1,128], index: 2, kind: input, shape index: {}]   ;;  %s3213_s3 = inlined_call_operand.hbm [shape: bf16[128,128], index: 3, kind: input, shape index: {}]   ;;  %s3214_s4 = inlined_call_operand.vmem [shape: f32[1,128], index: 4, kind: input, shape index: {}]   ;;  %s3215_s5 = inlined_call_operand.hbm [shape: bf16[128,128], index: 5, kind: input, shape index: {}]   ;;  %s3216_s6 = inlined_call_operand.vmem [shape: f32[1,128], index: 6, kind: input, shape index: {}]   ;;  %s3217_s7 = inlined_call_operand.hbm [shape: bf16[16,128], index: 7, kind: output, shape index: {}]  }
   0x1   :  { %3222 = sst [smem:[#allocation15_spill]] %s3211_s1 }
   0x2   :  { %3223 = sst [smem:[#allocation16_spill]] %s3213_s3 }
   0x3   :  { %12 = vsyncpa [#allocation3], 0 }
   0x4   :  { %14 = vsyncpa [#allocation3 + $0x1], 0 }
   0x5   :  { %15 = vsyncpa [#allocation6], 0 }
   0x6   :  { %16 = vsyncpa [#allocation9], 0 }
   0x7   :  { %17 = vsyncpa [#allocation4], 0 }
   0x8   :  { %19 = vsyncpa [#allocation4 + $0x1], 0  ;;  %s2983_s24 = smov 0   ;;  %s2985_s25 = smov 0  }
   0x9   :  { %s2987_s26 = smov 0   ;;  %s2989_s27 = smov 0  }
   0xa LB: > { %s3004_s28 = sadd.s32 4294967295, %s2932_s27   ;;  %s2096_s29 = sadd.s32 4294967294, %s2932_s27   ;;  %s2932_s27 = sphi %s2989_s27, %s3245_s27   ;;  %s2928_s26 = sphi %s2987_s26, %s3244_s26   ;;  %s2924_s25 = sphi %s2985_s25, %s3243_s25   ;;  %s2920_s24 = sphi %s2983_s24, %s3242_s24  }
   0xb   : > { %p45_p0 = scmp.ne.s32.totalorder %s2924_s25, %s2920_s24  ;;  %p3218_p1 = scmp.eq.s32.totalorder %s3004_s28, 0 }
   0xc   : > { %p201_p3 = scmp.eq.s32.totalorder %s2096_s29, 1  ;;  %p2097_p5 = scmp.ge.s32.totalorder %s2932_s27, 1 }
   0xd   : > { %p3013_p4 = por %p3218_p1, %p45_p0  ;;  %p208_p7 = scmp.lt.s32.totalorder %s2932_s27, 3 }
   0xe   : > { %p3018_p6 = por %p201_p3, %p45_p0  ;;  %s2934_s10 = smov [#allocation5]  }
   0xf   : > { %s3224_s30 = scalar_select %p3013_p4, 1, 0 }
  0x10   : > { %s3225_s8 = scalar_select %p3018_p6, 1, 0 }
  0x11   : > { %p3023_p8 = pnand %p2097_p5, %p208_p7  ;;  %s220_s11 = sshll.u32 %s2934_s10, 4  ;;  %s221_s11 = int_to_ptr.vmem [resolvable:$true] %s220_s11 }
  0x12   : > { %s2935_s13 = smov [#allocation7]   ;;  %s2936_s15 = smov [#allocation8]  }
  0x13   : > { %s3226_s9 = scalar_select %p3023_p8, 1, 0 }
  0x14   : > { %p2529_p9 = pneg %p3023_p8  ;;  %s236_s14 = sshll.u32 %s2935_s13, 4  ;;  %s237_s14 = int_to_ptr.vmem [resolvable:$true] %s236_s14 }
  0x15   : > { %s252_s16 = sshll.u32 %s2936_s15, 4  ;;  %s2765_s17 = scalar_lea.vmem %s221_s11, 16384  ;;  %s253_s16 = int_to_ptr.vmem [resolvable:$true] %s252_s16 }
  0x16   : > { %p3032_p11 = pnand %p2529_p9, %p3218_p1  ;;  %p2766_p13 = scmp.ne.s32.totalorder %s221_s11, %s2765_s17 }
  0x17   : > { %p2773_p5 = scmp.lt.s32.totalorder %s221_s11, %s221_s11  ;;  %p2774_p7 = scmp.lt.s32.totalorder %s2765_s17, %s2765_s17 }
  0x18   : > { %p2756_p12 = pneg %p3032_p11 }
  0x19   : > { %p2775_p9 = por %p2774_p7, %p2773_p5 }
  0x1a   : > { %p2768_p0 = pnand %p2766_p13, %p2756_p12 }
  0x1c   : > { %p2769_p3 = pneg %p2768_p0 }
  0x1e   : > { %p2776_p10 = pnand %p2775_p9, %p2769_p3 }
  0x20   : > { %2779 = shalt.err (!%p2776_p10)
}
  0x21   : > { %s2937_s18 = smov 64   ;;  %s2938_s19 = smov 4  }
  0x22   : > { %s3228_s1 = sld [smem:[#allocation15_spill]]  ;;  %s2791_s22 = scalar_lea.vmem %s237_s14, 1024 }
  0x23   : > { %p2792_p1 = scmp.ne.s32.totalorder %s237_s14, %s2791_s22  ;;  %p2799_p2 = scmp.lt.s32.totalorder %s237_s14, %s237_s14 }
  0x24   : > { %p2800_p6 = scmp.lt.s32.totalorder %s2791_s22, %s2791_s22 }
  0x25   : > { %p2794_p13 = pnand %p2792_p1, %p2756_p12 }
  0x26   : > { %p2801_p5 = por %p2800_p6, %p2799_p2 }
  0x27   : > { %p2795_p0 = pneg %p2794_p13 }
  0x28   : > { %2532 = dma.hbm_to_vmem [thread:$0]  (!%p3032_p11), %s3228_s1, 16384, %s221_s11, [#allocation6], %s2937_s18, %s2937_s18, %s2938_s19  }
  0x29   : > { %p2802_p3 = pnand %p2801_p5, %p2795_p0 }
  0x2b   : > { %2805 = shalt.err (!%p2802_p3)
}
  0x2c   : > { %s3229_s3 = sld [smem:[#allocation16_spill]]  ;;  %s2817_s10 = scalar_lea.vmem %s253_s16, 1024 }
  0x2d   : > { %p2818_p10 = scmp.ne.s32.totalorder %s253_s16, %s2817_s10  ;;  %p2825_p9 = scmp.lt.s32.totalorder %s253_s16, %s253_s16 }
  0x2e   : > { %p2826_p13 = scmp.lt.s32.totalorder %s2817_s10, %s2817_s10 }
  0x2f   : > { %p2820_p7 = pnand %p2818_p10, %p2756_p12 }
  0x30   : > { %p2827_p4 = por %p2826_p13, %p2825_p9 }
  0x31   : > { %p2821_p1 = pneg %p2820_p7 }
  0x32   : > { %2535 = dma.hbm_to_vmem [thread:$0]  (!%p3032_p11), %s3229_s3, 1024, %s237_s14, [#allocation6], %s2937_s18, %s2937_s18, %s2938_s19  }
  0x33   : > { %p2828_p2 = pnand %p2827_p4, %p2821_p1 }
  0x35   : > { %2831 = shalt.err (!%p2828_p2)
}
  0x36   : > { %2538 = dma.hbm_to_vmem [thread:$0]  (!%p3032_p11), %s3215_s5, 1024, %s253_s16, [#allocation9], %s2937_s18, %s2937_s18, %s2938_s19  }
  0x37   : > { %s3063_s14 = sadd.s32 1, %s2932_s27   ;;  %s32_s12 = sadd.s32 1, %s2928_s26 }
  0x38   : > { %s29_s15 = ssub.s32 %s2932_s27, %s3063_s14  ;;  %p39_p6 = scmp.ne.s32.totalorder %s2928_s26, %s2924_s25 }
  0x39   : > { %p30_p4 = scmp.eq.s32.totalorder %s29_s15, 0  ;;  %p40_p12 = scmp.eq.s32.totalorder %s2932_s27, 0 }
  0x3a   : > { %p2550_p0 = scmp.lt.s32.totalorder %s2932_s27, 2  ;;  %p3230_p3 = scmp.eq.s32.totalorder %s3004_s28, 1 }
  0x3b   : > { %s3073_s17 = scalar_select %p30_p4, %s2928_s26, %s32_s12  }
  0x3c   : > { %p41_p5 = por %p40_p12, %p39_p6  ;;  %p3077_p10 = por %p3230_p3, %p39_p6 }
  0x3d   : > { %s269_s21 = sand.u32 1, %s2928_s26   ;;  %s2278_s22 = sshll.u32 %s2932_s27, 10 }
  0x3e   : > { %s3231_s20 = scalar_select %p3077_p10, 1, 0 }
  0x3f   : > { %s2102_s16 = sshll.u32 %s269_s21, 6  ;;  %s3086_s23 = scalar_lea.hbm %s3210_s0, %s2278_s22 }
  0x40   : > { %s273_s29 = scalar_lea.vmem [#allocation2], %s2102_s16  ;;  %p3088_p11 = pnand %p2550_p0, %p41_p5 }
  0x41   : > { %s281_s10 = sshll.u32 %s273_s29, 4  ;;  %s270_s13 = scalar_lea.sflag [#allocation3], %s269_s21  ;;  %s282_s10 = int_to_ptr.vmem [resolvable:$true] %s281_s10 }
  0x42   : > { %s2832_s15 = scalar_lea.hbm %s3086_s23, 1024  ;;  %p2834_p1 = pneg %p3088_p11 }
  0x43   : > { %p2833_p7 = scmp.ne.s32.totalorder %s3086_s23, %s2832_s15  ;;  %s2837_s18 = scalar_lea.hbm %s3210_s0, 2048 }
  0x44   : > { %p2838_p2 = scmp.lt.s32.totalorder %s3086_s23, %s3210_s0  ;;  %p2839_p4 = scmp.lt.s32.totalorder %s2837_s18, %s2832_s15 }
  0x45   : > { %p2835_p9 = pnand %p2834_p1, %p2833_p7 }
  0x46   : > { %p2840_p6 = por %p2839_p4, %p2838_p2 }
  0x47   : > { %p2836_p13 = pneg %p2835_p9 }
  0x49   : > { %p2841_p12 = pnand %p2840_p6, %p2836_p13 }
  0x4b   : > { %2844 = shalt.err (!%p2841_p12)
}
  0x4c   : > { %s2845_s29 = scalar_lea.vmem %s282_s10, 1024  ;;  %s2939_s21 = smov [#allocation2]  }
  0x4d   : > { %p2846_p0 = scmp.ne.s32.totalorder %s282_s10, %s2845_s29  ;;  %s2850_s1 = sshll.u32 %s2939_s21, 4  ;;  %s2851_s1 = int_to_ptr.vmem [resolvable:$false] %s2850_s1 }
  0x4e   : > { %s2852_s3 = scalar_lea.vmem %s2851_s1, 2048  ;;  %p2853_p7 = scmp.lt.s32.totalorder %s282_s10, %s2851_s1 }
  0x4f   : > { %p2848_p5 = pnand %p2846_p0, %p2834_p1  ;;  %p2854_p9 = scmp.lt.s32.totalorder %s2852_s3, %s2845_s29 }
  0x51   : > { %p2849_p3 = pneg %p2848_p5  ;;  %p2855_p10 = por %p2854_p9, %p2853_p7 }
  0x53   : > { %p2856_p8 = pnand %p2855_p10, %p2849_p3 }
  0x55   : > { %2859 = shalt.err (!%p2856_p8)
}
  0x56   : > { %2542 = dma.hbm_to_vmem [thread:$0]  (!%p3088_p11), %s3086_s23, 1024, %s282_s10, %s270_s13  }
  0x57   : > { %p3233_p13 = scmp.ne.s32.totalorder %s3226_s9, 0 }
  0x58   : > { %s3109_s15 = sand.u32 (!%p3233_p13), 1, %s2924_s25   ;;  %p3234_p1 = scmp.ne.s32.totalorder (!%p3233_p13), %s3224_s30, 0 }
  0x59   : > { %290 = sbr.rel (%p3233_p13) target bundleno = 846 (0x34e), region = 48  ;;  %s2106_s12 = sshll.u32 (!%p3233_p13), %s3109_s15, 6 }
  0x5a   : > { %s293_s22 = scalar_lea.sflag (!%p3233_p13), [#allocation3], %s3109_s15  ;;  %s3113_s1 = scalar_lea.vmem (!%p3233_p13), [#allocation2], %s2106_s12 }
  0x5e   : > { %2903 = dma.done.wait (%p3234_p1), %s293_s22, 1024  }
  0x5f   : > { %2905 = vsyncadd (%p3234_p1), %s293_s22, 4294966272  ;;  %p3235_p8 = scmp.eq.s32.totalorder %s3004_s28, 0 }
  0x61   : > { %2907 = dma.done.wait (%p3235_p8), [#allocation6], 17408   ;;  %p3236_p10 = pmov %p3235_p8 }
  0x62   : > { %p3237_p11 = pmov %p3235_p8 }
  0x63   : > { %2909 = vsyncadd (%p3236_p10), [#allocation6], 4294949888 }
  0x64   : > { %2911 = dma.done.wait (%p3237_p11), [#allocation9], 1024   ;;  %p3238_p2 = pmov %p3235_p8 }
  0x65   : > { %v2594_v0 = vld [vmem:[#allocation5 + $0x78] sm:$0xff]   ;;  %v2598_v4 = vld [vmem:[#allocation5 + $0x70] sm:$0xff]   ;;  %v2602_v8 = vld [vmem:[#allocation5 + $0x68] sm:$0xff]   ;;  %vm2941_vm0 = vmmov 0   ;;  %s2110_s10 = sshll.u32 %s3109_s15, 2  ;;  %s2275_s18 = sshll.u32 %s3004_s28, 6 }
  0x66   : > { %2913 = vsyncadd (%p3238_p2), [#allocation9], 4294966272  ;;  %v2595_v1 = vld [vmem:[#allocation5 + $0xf8] sm:$0xff]   ;;  %2279 = vmatprep.subr.bf16.mxu0 %v2594_v0  ;;  %v2599_v5 = vld [vmem:[#allocation5 + $0xf0] sm:$0xff]   ;;  %s338_s19 = scalar_lea.vmem [#allocation10], %s2110_s10  ;;  %s3167_s12 = scalar_lea.hbm %s3217_s7, %s2275_s18 }
  0x67   : > { %v2596_v2 = vld [vmem:[#allocation5 + $0x38] sm:$0xff]   ;;  %2301 = vmatprep.subr.bf16.mxu1 %v2595_v1  ;;  %v2600_v6 = vld [vmem:[#allocation5 + $0x30] sm:$0xff]   ;;  %v2603_v9 = vld [vmem:[#allocation5 + $0xe8] sm:$0xff]   ;;  %s1997_s16 = sshll.u32 %s338_s19, 4  ;;  %s1984_s22 = scalar_lea.sflag [#allocation4], %s3109_s15  ;;  %s3169_s16 = int_to_ptr.vmem [resolvable:$true] %s1997_s16 }
  0x68   : > { %v2597_v3 = vld [vmem:[#allocation5 + $0xb8] sm:$0xff]   ;;  %2280 = vmatpush3.bf16.msra.mxu0 %v2596_v2  ;;  %v2601_v7 = vld [vmem:[#allocation5 + $0xb0] sm:$0xff]   ;;  %v2604_v10 = vld [vmem:[#allocation5 + $0x28] sm:$0xff]   ;;  %s2860_s28 = scalar_lea.vmem %s3169_s16, 64  ;;  %p3239_p6 = scmp.ne.s32.totalorder %s3231_s20, 0 }
  0x69   : > { %2302 = vmatpush3.bf16.msra.mxu1 %v2597_v3  ;;  %2281 = vmatprep.subr.bf16.mxu0 %v2598_v4  ;;  %v2605_v11 = vld [vmem:[#allocation5 + $0xa8] sm:$0xff]   ;;  %v2606_v12 = vld [vmem:[#allocation5 + $0x60] sm:$0xff]   ;;  %v2610_v16 = vld [vmem:[#allocation5 + $0x58] sm:$0xff]   ;;  %p2861_p4 = scmp.ne.s32.totalorder %s3169_s16, %s2860_s28 }
  0x6a   : > { %2303 = vmatprep.subr.bf16.mxu1 %v2599_v5  ;;  %v2607_v13 = vld [vmem:[#allocation5 + $0xe0] sm:$0xff]   ;;  %v2611_v17 = vld [vmem:[#allocation5 + $0xd8] sm:$0xff]   ;;  %v2614_v20 = vld [vmem:[#allocation5 + $0x50] sm:$0xff]  }
  0x6b   : > { %v2608_v14 = vld [vmem:[#allocation5 + $0x20] sm:$0xff]   ;;  %v2612_v18 = vld [vmem:[#allocation5 + $0x18] sm:$0xff]   ;;  %v2615_v21 = vld [vmem:[#allocation5 + $0xd0] sm:$0xff]   ;;  %p2862_p12 = pnand %p2861_p4, %p3239_p6 }
  0x6c   : > { %2282 = vmatpush3.bf16.msra.mxu0 %v2600_v6  ;;  %v2609_v15 = vld [vmem:[#allocation5 + $0xa0] sm:$0xff]   ;;  %v2613_v19 = vld [vmem:[#allocation5 + $0x98] sm:$0xff]   ;;  %v2616_v22 = vld [vmem:[#allocation5 + $0x10] sm:$0xff]  }
  0x6d   : > { %2304 = vmatpush3.bf16.msra.mxu1 %v2601_v7  ;;  %2283 = vmatprep.subr.bf16.mxu0 %v2602_v8  ;;  %v2617_v23 = vld [vmem:[#allocation5 + $0x90] sm:$0xff]   ;;  %v2618_v24 = vld [vmem:[#allocation5 + $0x48] sm:$0xff]   ;;  %v2622_v28 = vld [vmem:[#allocation5 + $0x40] sm:$0xff]   ;;  %p2863_p0 = pneg %p2862_p12 }
  0x6e   : > { %2305 = vmatprep.subr.bf16.mxu1 %v2603_v9  ;;  %v2619_v25 = vld [vmem:[#allocation5 + $0xc8] sm:$0xff]   ;;  %v2623_v29 = vld [vmem:[#allocation5 + $0xc0] sm:$0xff]   ;;  %v2630_v38 = vld [vmem:[#allocation5 + $0x178] sm:$0xff]  }
  0x6f   : > { %v2620_v26 = vld [vmem:[#allocation5 + $0x8] sm:$0xff]   ;;  %v2624_v30 = vld [vmem:[#allocation5] sm:$0xff]   ;;  %v2631_v39 = vld [vmem:[#allocation5 + $0x1f8] sm:$0xff]  }
  0x70   : > { %2284 = vmatpush3.bf16.msra.mxu0 %v2604_v10  ;;  %v2621_v27 = vld [vmem:[#allocation5 + $0x88] sm:$0xff]   ;;  %v2625_v31 = vld [vmem:[#allocation5 + $0x80] sm:$0xff]   ;;  %v2632_v40 = vld [vmem:[#allocation5 + $0x138] sm:$0xff]  }
  0x71   : > { %2306 = vmatpush3.bf16.msra.mxu1 %v2605_v11  ;;  %2285 = vmatprep.subr.bf16.mxu0 %v2606_v12  ;;  %v340_v32 = vld [vmem:[%s3113_s1] sm:$0xff]  ;;  %v341_v33 = vld [vmem:[%s3113_s1 + $0x8] sm:$0xff]  ;;  %v2633_v41 = vld [vmem:[#allocation5 + $0x1b8] sm:$0xff]  }
  0x72   : > { %2307 = vmatprep.subr.bf16.mxu1 %v2607_v13  ;;  %v2112_v34 = vcombine.low %v340_v32, %v340_v32  ;;  %v2113_v35 = vcombine.high %v340_v32, %v340_v32  ;;  %v2114_v36 = vcombine.low %v341_v33, %v341_v33  ;;  %v2115_v37 = vcombine.high %v341_v33, %v341_v33  ;;  %v2634_v42 = vld [vmem:[#allocation5 + $0x170] sm:$0xff]   ;;  %v2638_v46 = vld [vmem:[#allocation5 + $0x168] sm:$0xff]   ;;  %v2642_v50 = vld [vmem:[#allocation5 + $0x160] sm:$0xff]  }
  0x73   : > { %v2635_v43 = vld [vmem:[#allocation5 + $0x1f0] sm:$0xff]   ;;  %v2639_v47 = vld [vmem:[#allocation5 + $0x1e8] sm:$0xff]   ;;  %v2643_v51 = vld [vmem:[#allocation5 + $0x1e0] sm:$0xff]  }
  0x74   : > { %2286 = vmatpush3.bf16.msra.mxu0 %v2608_v14  ;;  %1467 = vmatprep.mubr.bf16.mxu0 %v2113_v35  ;;  %v2636_v44 = vld [vmem:[#allocation5 + $0x130] sm:$0xff]   ;;  %v2640_v48 = vld [vmem:[#allocation5 + $0x128] sm:$0xff]   ;;  %v2644_v52 = vld [vmem:[#allocation5 + $0x120] sm:$0xff]  }
  0x75   : > { %2308 = vmatpush3.bf16.msra.mxu1 %v2609_v15  ;;  %2287 = vmatprep.subr.bf16.mxu0 %v2610_v16  ;;  %v2637_v45 = vld [vmem:[#allocation5 + $0x1b0] sm:$0xff]   ;;  %v2641_v49 = vld [vmem:[#allocation5 + $0x1a8] sm:$0xff]   ;;  %v2645_v53 = vld [vmem:[#allocation5 + $0x1a0] sm:$0xff]  }
  0x76   : > { %2309 = vmatprep.subr.bf16.mxu1 %v2611_v17  ;;  %1507 = vmatprep.mubr.bf16.mxu1 %v2115_v37  ;;  %v2646_v54 = vld [vmem:[#allocation5 + $0x158] sm:$0xff]   ;;  %v2650_v58 = vld [vmem:[#allocation5 + $0x150] sm:$0xff]   ;;  %v2654_v62 = vld [vmem:[#allocation5 + $0x148] sm:$0xff]  }
  0x77   : > { %v2647_v55 = vld [vmem:[#allocation5 + $0x1d8] sm:$0xff]   ;;  %v2651_v59 = vld [vmem:[#allocation5 + $0x1d0] sm:$0xff]   ;;  %v2655_v63 = vld [vmem:[#allocation5 + $0x1c8] sm:$0xff]  }
  0x78   : > { %2288 = vmatpush3.bf16.msra.mxu0 %v2612_v18  ;;  %v2648_v56 = vld [vmem:[#allocation5 + $0x118] sm:$0xff]   ;;  %v2652_v60 = vld [vmem:[#allocation5 + $0x110] sm:$0xff]   ;;  %v2656_v0 = vld [vmem:[#allocation5 + $0x108] sm:$0xff]  }
  0x79   : > { %2310 = vmatpush3.bf16.msra.mxu1 %v2613_v19  ;;  %2289 = vmatprep.subr.bf16.mxu0 %v2614_v20  ;;  %v2649_v57 = vld [vmem:[#allocation5 + $0x198] sm:$0xff]   ;;  %v2653_v61 = vld [vmem:[#allocation5 + $0x190] sm:$0xff]   ;;  %v2657_v1 = vld [vmem:[#allocation5 + $0x188] sm:$0xff]  }
  0x7a   : > { %2311 = vmatprep.subr.bf16.mxu1 %v2615_v21  ;;  %v2658_v2 = vld [vmem:[#allocation5 + $0x140] sm:$0xff]   ;;  %v342_v6 = vld [vmem:[%s3113_s1 + $0x10] sm:$0xff]  ;;  %v343_v9 = vld [vmem:[%s3113_s1 + $0x18] sm:$0xff] }
  0x7b   : > { %v2659_v3 = vld [vmem:[#allocation5 + $0x1c0] sm:$0xff]   ;;  %v2116_v7 = vcombine.low %v342_v6, %v342_v6  ;;  %v2117_v8 = vcombine.high %v342_v6, %v342_v6  ;;  %v2118_v10 = vcombine.low %v343_v9, %v343_v9  ;;  %v2119_v11 = vcombine.high %v343_v9, %v343_v9  ;;  %v2666_v12 = vld [vmem:[#allocation5 + $0x278] sm:$0xff]   ;;  %v2670_v16 = vld [vmem:[#allocation5 + $0x270] sm:$0xff]  }
  0x7c   : > { %2290 = vmatpush3.bf16.msra.mxu0 %v2616_v22  ;;  %v2660_v4 = vld [vmem:[#allocation5 + $0x100] sm:$0xff]   ;;  %v2667_v13 = vld [vmem:[#allocation5 + $0x2f8] sm:$0xff]   ;;  %v2671_v17 = vld [vmem:[#allocation5 + $0x2f0] sm:$0xff]  }
  0x7d   : > { %2312 = vmatpush3.bf16.msra.mxu1 %v2617_v23  ;;  %2291 = vmatprep.subr.bf16.mxu0 %v2618_v24  ;;  %v2661_v5 = vld [vmem:[#allocation5 + $0x180] sm:$0xff]   ;;  %v2668_v14 = vld [vmem:[#allocation5 + $0x238] sm:$0xff]   ;;  %v2672_v18 = vld [vmem:[#allocation5 + $0x230] sm:$0xff]  }
  0x7e   : > { %2313 = vmatprep.subr.bf16.mxu1 %v2619_v25  ;;  %v2669_v15 = vld [vmem:[#allocation5 + $0x2b8] sm:$0xff]   ;;  %v2673_v19 = vld [vmem:[#allocation5 + $0x2b0] sm:$0xff]   ;;  %v2674_v20 = vld [vmem:[#allocation5 + $0x268] sm:$0xff]  }
  0x7f   : > { %v2675_v21 = vld [vmem:[#allocation5 + $0x2e8] sm:$0xff]   ;;  %v2678_v24 = vld [vmem:[#allocation5 + $0x260] sm:$0xff]   ;;  %v2686_v32 = vld [vmem:[#allocation5 + $0x250] sm:$0xff]  }
  0x80   : > { %2292 = vmatpush3.bf16.msra.mxu0 %v2620_v26  ;;  %v2676_v22 = vld [vmem:[#allocation5 + $0x228] sm:$0xff]   ;;  %v2679_v25 = vld [vmem:[#allocation5 + $0x2e0] sm:$0xff]   ;;  %v2687_v33 = vld [vmem:[#allocation5 + $0x2d0] sm:$0xff]  }
  0x81   : > { %2314 = vmatpush3.bf16.msra.mxu1 %v2621_v27  ;;  %2293 = vmatprep.subr.bf16.mxu0 %v2622_v28  ;;  %v2677_v23 = vld [vmem:[#allocation5 + $0x2a8] sm:$0xff]   ;;  %v2680_v26 = vld [vmem:[#allocation5 + $0x220] sm:$0xff]   ;;  %v2682_v28 = vld [vmem:[#allocation5 + $0x258] sm:$0xff]  }
  0x82   : > { %2315 = vmatprep.subr.bf16.mxu1 %v2623_v29  ;;  %v2681_v27 = vld [vmem:[#allocation5 + $0x2a0] sm:$0xff]   ;;  %v2683_v29 = vld [vmem:[#allocation5 + $0x2d8] sm:$0xff]   ;;  %v2689_v35 = vld [vmem:[#allocation5 + $0x290] sm:$0xff]  }
  0x83   : > { %v2691_v37 = vld [vmem:[#allocation5 + $0x2c8] sm:$0xff]   ;;  %v2722_v6 = vld [vmem:[#allocation5 + $0x350] sm:$0xff]  }
  0x84   : > { %2294 = vmatpush3.bf16.msra.mxu0 %v2624_v30  ;;  %v2684_v30 = vld [vmem:[#allocation5 + $0x218] sm:$0xff]   ;;  %v2725_v9 = vld [vmem:[#allocation5 + $0x390] sm:$0xff]  }
  0x85   : > { %2316 = vmatpush3.bf16.msra.mxu1 %v2625_v31  ;;  %2323 = vmatprep.subr.bf16.mxu0 %v2630_v38  ;;  %v2685_v31 = vld [vmem:[#allocation5 + $0x298] sm:$0xff]   ;;  %v2692_v38 = vld [vmem:[#allocation5 + $0x208] sm:$0xff]  }
  0x86   : > { %2345 = vmatprep.subr.bf16.mxu1 %v2631_v39  ;;  %v2693_v39 = vld [vmem:[#allocation5 + $0x288] sm:$0xff]  }
  0x87   : > { %1468 = vmatmul.mubr.bf16.vlgmr.msra.gmra.mxu0 %v2112_v34  ;;  %v2688_v34 = vld [vmem:[#allocation5 + $0x210] sm:$0xff]  }
  0x88   : > { %1508 = vmatmul.mubr.bf16.vlgmr.msra.gmra.mxu1 %v2114_v36  ;;  %2324 = vmatpush3.bf16.msra.mxu0 %v2632_v40  ;;  %v2690_v36 = vld [vmem:[#allocation5 + $0x248] sm:$0xff]   ;;  %v2694_v40 = vld [vmem:[#allocation5 + $0x240] sm:$0xff]  }
  0x89   : > { %2346 = vmatpush3.bf16.msra.mxu1 %v2633_v41  ;;  %2325 = vmatprep.subr.bf16.mxu0 %v2634_v42  ;;  %v2695_v41 = vld [vmem:[#allocation5 + $0x2c0] sm:$0xff]  }
  0x8a   : > { %2347 = vmatprep.subr.bf16.mxu1 %v2635_v43  ;;  %1547 = vmatprep.mubr.bf16.mxu0 %v2117_v8  ;;  %v2696_v42 = vld [vmem:[#allocation5 + $0x200] sm:$0xff]   ;;  %v2724_v8 = vld [vmem:[#allocation5 + $0x310] sm:$0xff]  }
  0x8b   : > { %1587 = vmatprep.mubr.bf16.mxu1 %v2119_v11  ;;  %v2697_v43 = vld [vmem:[#allocation5 + $0x280] sm:$0xff]   ;;  %v2727_v11 = vld [vmem:[#allocation5 + $0x3c8] sm:$0xff]  }
  0x8c   : > { %2326 = vmatpush3.bf16.msra.mxu0 %v2636_v44  ;;  %v344_v44 = vld [vmem:[%s3113_s1 + $0x20] sm:$0xff] }
  0x8d   : > { %2348 = vmatpush3.bf16.msra.mxu1 %v2637_v45  ;;  %2327 = vmatprep.subr.bf16.mxu0 %v2638_v46  ;;  %v345_v45 = vld [vmem:[%s3113_s1 + $0x28] sm:$0xff]  ;;  %v2120_v46 = vcombine.low %v344_v44, %v344_v44 }
  0x8e   : > { %2349 = vmatprep.subr.bf16.mxu1 %v2639_v47  ;;  %v2121_v47 = vcombine.high %v344_v44, %v344_v44 }
  0x90   : > { %2328 = vmatpush3.bf16.msra.mxu0 %v2640_v48  ;;  %v2122_v48 = vcombine.low %v345_v45, %v345_v45 }
  0x91   : > { %2350 = vmatpush3.bf16.msra.mxu1 %v2641_v49  ;;  %2329 = vmatprep.subr.bf16.mxu0 %v2642_v50  ;;  %v2123_v49 = vcombine.high %v345_v45, %v345_v45  ;;  %v2702_v50 = vld [vmem:[#allocation5 + $0x378] sm:$0xff]  }
  0x92   : > { %2351 = vmatprep.subr.bf16.mxu1 %v2643_v51  ;;  %v2703_v51 = vld [vmem:[#allocation5 + $0x3f8] sm:$0xff]  }
  0x94   : > { %2330 = vmatpush3.bf16.msra.mxu0 %v2644_v52  ;;  %v2704_v52 = vld [vmem:[#allocation5 + $0x338] sm:$0xff]  }
  0x95   : > { %2352 = vmatpush3.bf16.msra.mxu1 %v2645_v53  ;;  %2331 = vmatprep.subr.bf16.mxu0 %v2646_v54  ;;  %v2705_v53 = vld [vmem:[#allocation5 + $0x3b8] sm:$0xff]   ;;  %v2706_v54 = vld [vmem:[#allocation5 + $0x370] sm:$0xff]  }
  0x96   : > { %2353 = vmatprep.subr.bf16.mxu1 %v2647_v55  ;;  %v2707_v55 = vld [vmem:[#allocation5 + $0x3f0] sm:$0xff]  }
  0x98   : > { %2332 = vmatpush3.bf16.msra.mxu0 %v2648_v56  ;;  %v2708_v56 = vld [vmem:[#allocation5 + $0x330] sm:$0xff]  }
  0x99   : > { %2354 = vmatpush3.bf16.msra.mxu1 %v2649_v57  ;;  %2333 = vmatprep.subr.bf16.mxu0 %v2650_v58  ;;  %v2709_v57 = vld [vmem:[#allocation5 + $0x3b0] sm:$0xff]   ;;  %v2710_v58 = vld [vmem:[#allocation5 + $0x368] sm:$0xff]  }
  0x9a   : > { %2355 = vmatprep.subr.bf16.mxu1 %v2651_v59  ;;  %v2711_v59 = vld [vmem:[#allocation5 + $0x3e8] sm:$0xff]  }
  0x9c   : > { %2334 = vmatpush3.bf16.msra.mxu0 %v2652_v60  ;;  %v2712_v60 = vld [vmem:[#allocation5 + $0x328] sm:$0xff]  }
  0x9d   : > { %2356 = vmatpush3.bf16.msra.mxu1 %v2653_v61  ;;  %2335 = vmatprep.subr.bf16.mxu0 %v2654_v62  ;;  %v2713_v61 = vld [vmem:[#allocation5 + $0x3a8] sm:$0xff]   ;;  %v2714_v62 = vld [vmem:[#allocation5 + $0x360] sm:$0xff]  }
  0x9e   : > { %2357 = vmatprep.subr.bf16.mxu1 %v2655_v63  ;;  %v2715_v63 = vld [vmem:[#allocation5 + $0x3e0] sm:$0xff]  }
  0xa0   : > { %2336 = vmatpush3.bf16.msra.mxu0 %v2656_v0  ;;  %v2716_v0 = vld [vmem:[#allocation5 + $0x320] sm:$0xff]  }
  0xa1   : > { %2358 = vmatpush3.bf16.msra.mxu1 %v2657_v1  ;;  %2337 = vmatprep.subr.bf16.mxu0 %v2658_v2  ;;  %v2717_v1 = vld [vmem:[#allocation5 + $0x3a0] sm:$0xff]   ;;  %v2718_v2 = vld [vmem:[#allocation5 + $0x358] sm:$0xff]  }
  0xa2   : > { %2359 = vmatprep.subr.bf16.mxu1 %v2659_v3  ;;  %v2719_v3 = vld [vmem:[#allocation5 + $0x3d8] sm:$0xff]  }
  0xa4   : > { %2338 = vmatpush3.bf16.msra.mxu0 %v2660_v4  ;;  %v2720_v4 = vld [vmem:[#allocation5 + $0x318] sm:$0xff]  }
  0xa5   : > { %2360 = vmatpush3.bf16.msra.mxu1 %v2661_v5  ;;  %2367 = vmatprep.subr.bf16.mxu0 %v2666_v12  ;;  %v2721_v5 = vld [vmem:[#allocation5 + $0x398] sm:$0xff]   ;;  %v2728_v12 = vld [vmem:[#allocation5 + $0x308] sm:$0xff]  }
  0xa6   : > { %2389 = vmatprep.subr.bf16.mxu1 %v2667_v13  ;;  %v2729_v13 = vld [vmem:[#allocation5 + $0x388] sm:$0xff]  }
  0xa7   : > { %1548 = vmatmul.mubr.bf16.vlgmr.msra.gmra.mxu0 %v2116_v7  ;;  %v2723_v7 = vld [vmem:[#allocation5 + $0x3d0] sm:$0xff]  }
  0xa8   : > { %1588 = vmatmul.mubr.bf16.vlgmr.msra.gmra.mxu1 %v2118_v10  ;;  %2368 = vmatpush3.bf16.msra.mxu0 %v2668_v14  ;;  %v2726_v10 = vld [vmem:[#allocation5 + $0x348] sm:$0xff]   ;;  %v2730_v14 = vld [vmem:[#allocation5 + $0x340] sm:$0xff]  }
  0xa9   : > { %2390 = vmatpush3.bf16.msra.mxu1 %v2669_v15  ;;  %2369 = vmatprep.subr.bf16.mxu0 %v2670_v16  ;;  %v2731_v15 = vld [vmem:[#allocation5 + $0x3c0] sm:$0xff]  }
  0xaa   : > { %2391 = vmatprep.subr.bf16.mxu1 %v2671_v17  ;;  %1627 = vmatprep.mubr.bf16.mxu0 %v2121_v47  ;;  %v2732_v16 = vld [vmem:[#allocation5 + $0x300] sm:$0xff]  }
  0xab   : > { %1667 = vmatprep.mubr.bf16.mxu1 %v2123_v49  ;;  %v2733_v17 = vld [vmem:[#allocation5 + $0x380] sm:$0xff]  }
  0xac   : > { %2370 = vmatpush3.bf16.msra.mxu0 %v2672_v18  ;;  %v346_v18 = vld [vmem:[%s3113_s1 + $0x30] sm:$0xff] }
  0xad   : > { %2392 = vmatpush3.bf16.msra.mxu1 %v2673_v19  ;;  %2371 = vmatprep.subr.bf16.mxu0 %v2674_v20  ;;  %v347_v19 = vld [vmem:[%s3113_s1 + $0x38] sm:$0xff]  ;;  %v2124_v20 = vcombine.low %v346_v18, %v346_v18  ;;  %s2942_s1 = smov [#allocation10]  }
  0xae   : > { %2393 = vmatprep.subr.bf16.mxu1 %v2675_v21  ;;  %v2125_v21 = vcombine.high %v346_v18, %v346_v18  ;;  %s2864_s3 = sshll.u32 %s2942_s1, 4  ;;  %s2865_s3 = int_to_ptr.vmem [resolvable:$false] %s2864_s3 }
  0xaf   : > { %s2866_s30 = scalar_lea.vmem %s2865_s3, 128  ;;  %p2867_p5 = scmp.lt.s32.totalorder %s3169_s16, %s2865_s3 }
  0xb0   : > { %2372 = vmatpush3.bf16.msra.mxu0 %v2676_v22  ;;  %v2126_v22 = vcombine.low %v347_v19, %v347_v19  ;;  %p2868_p3 = scmp.lt.s32.totalorder %s2866_s30, %s2860_s28 }
  0xb1   : > { %2394 = vmatpush3.bf16.msra.mxu1 %v2677_v23  ;;  %2373 = vmatprep.subr.bf16.mxu0 %v2678_v24  ;;  %v2127_v23 = vcombine.high %v347_v19, %v347_v19  ;;  %v2738_v24 = vld [vmem:[#allocation7 + $0x38] sm:$0xff]  }
  0xb2   : > { %2395 = vmatprep.subr.bf16.mxu1 %v2679_v25  ;;  %v2940_v25 = vmov 0.0   ;;  %p2869_p7 = por %p2868_p3, %p2867_p5 }
  0xb4   : > { %2374 = vmatpush3.bf16.msra.mxu0 %v2680_v26  ;;  %v2739_v26 = vld [vmem:[#allocation7 + $0x30] sm:$0xff]   ;;  %p2870_p9 = pnand %p2869_p7, %p2863_p0 }
  0xb5   : > { %2396 = vmatpush3.bf16.msra.mxu1 %v2681_v27  ;;  %2375 = vmatprep.subr.bf16.mxu0 %v2682_v28  ;;  %v2740_v27 = vld [vmem:[#allocation7 + $0x28] sm:$0xff]   ;;  %v2741_v28 = vld [vmem:[#allocation7 + $0x20] sm:$0xff]  }
  0xb6   : > { %2397 = vmatprep.subr.bf16.mxu1 %v2683_v29  ;;  %v2742_v29 = vld [vmem:[#allocation7 + $0x18] sm:$0xff]  }
  0xb8   : > { %2376 = vmatpush3.bf16.msra.mxu0 %v2684_v30  ;;  %v2743_v30 = vld [vmem:[#allocation7 + $0x10] sm:$0xff]  }
  0xb9   : > { %2398 = vmatpush3.bf16.msra.mxu1 %v2685_v31  ;;  %2377 = vmatprep.subr.bf16.mxu0 %v2686_v32  ;;  %v2744_v31 = vld [vmem:[#allocation7 + $0x8] sm:$0xff]   ;;  %v2745_v32 = vld [vmem:[#allocation7] sm:$0xff]  }
  0xba   : > { %2399 = vmatprep.subr.bf16.mxu1 %v2687_v33  ;;  %v2746_v33 = vld [vmem:[#allocation8 + $0x38] sm:$0xff]  }
  0xbc   : > { %2378 = vmatpush3.bf16.msra.mxu0 %v2688_v34  ;;  %v2747_v34 = vld [vmem:[#allocation8 + $0x30] sm:$0xff]  }
  0xbd   : > { %2400 = vmatpush3.bf16.msra.mxu1 %v2689_v35  ;;  %2379 = vmatprep.subr.bf16.mxu0 %v2690_v36  ;;  %v2748_v35 = vld [vmem:[#allocation8 + $0x28] sm:$0xff]   ;;  %v2749_v36 = vld [vmem:[#allocation8 + $0x20] sm:$0xff]  }
  0xbe   : > { %2401 = vmatprep.subr.bf16.mxu1 %v2691_v37  ;;  %v2750_v37 = vld [vmem:[#allocation8 + $0x18] sm:$0xff]  }
  0xc0   : > { %2380 = vmatpush3.bf16.msra.mxu0 %v2692_v38 }
  0xc1   : > { %2402 = vmatpush3.bf16.msra.mxu1 %v2693_v39  ;;  %2381 = vmatprep.subr.bf16.mxu0 %v2694_v40  ;;  %v2751_v40 = vld [vmem:[#allocation8 + $0x10] sm:$0xff]  }
  0xc2   : > { %2403 = vmatprep.subr.bf16.mxu1 %v2695_v41  ;;  %v2111_v41 = vld [vmem:[%s3212_s2] ss:$0 sm:$0xff] }
  0xc4   : > { %2382 = vmatpush3.bf16.msra.mxu0 %v2696_v42 }
  0xc5   : > { %2404 = vmatpush3.bf16.msra.mxu1 %v2697_v43  ;;  %2411 = vmatprep.subr.bf16.mxu0 %v2702_v50 }
  0xc6   : > { %2433 = vmatprep.subr.bf16.mxu1 %v2703_v51 }
  0xc7   : > { %1628 = vmatmul.mubr.bf16.vlgmr.msra.gmra.mxu0 %v2120_v46 }
  0xc8   : > { %1668 = vmatmul.mubr.bf16.vlgmr.msra.gmra.mxu1 %v2122_v48  ;;  %2412 = vmatpush3.bf16.msra.mxu0 %v2704_v52 }
  0xc9   : > { %2434 = vmatpush3.bf16.msra.mxu1 %v2705_v53  ;;  %2413 = vmatprep.subr.bf16.mxu0 %v2706_v54 }
  0xca   : > { %2435 = vmatprep.subr.bf16.mxu1 %v2707_v55  ;;  %1707 = vmatprep.mubr.bf16.mxu0 %v2125_v21 }
  0xcb   : > { %1747 = vmatprep.mubr.bf16.mxu1 %v2127_v23 }
  0xcc   : > { %2414 = vmatpush3.bf16.msra.mxu0 %v2708_v56 }
  0xcd   : > { %2436 = vmatpush3.bf16.msra.mxu1 %v2709_v57  ;;  %2415 = vmatprep.subr.bf16.mxu0 %v2710_v58 }
  0xce   : > { %2437 = vmatprep.subr.bf16.mxu1 %v2711_v59 }
  0xd0   : > { %2416 = vmatpush3.bf16.msra.mxu0 %v2712_v60 }
  0xd1   : > { %2438 = vmatpush3.bf16.msra.mxu1 %v2713_v61  ;;  %2417 = vmatprep.subr.bf16.mxu0 %v2714_v62 }
  0xd2   : > { %2439 = vmatprep.subr.bf16.mxu1 %v2715_v63 }
  0xd4   : > { %2418 = vmatpush3.bf16.msra.mxu0 %v2716_v0 }
  0xd5   : > { %2440 = vmatpush3.bf16.msra.mxu1 %v2717_v1  ;;  %2419 = vmatprep.subr.bf16.mxu0 %v2718_v2 }
  0xd6   : > { %2441 = vmatprep.subr.bf16.mxu1 %v2719_v3 }
  0xd8   : > { %2420 = vmatpush3.bf16.msra.mxu0 %v2720_v4 }
  0xd9   : > { %2442 = vmatpush3.bf16.msra.mxu1 %v2721_v5  ;;  %2421 = vmatprep.subr.bf16.mxu0 %v2722_v6 }
  0xda   : > { %2443 = vmatprep.subr.bf16.mxu1 %v2723_v7 }
  0xdc   : > { %2422 = vmatpush3.bf16.msra.mxu0 %v2724_v8 }
  0xdd   : > { %2444 = vmatpush3.bf16.msra.mxu1 %v2725_v9  ;;  %2423 = vmatprep.subr.bf16.mxu0 %v2726_v10 }
  0xde   : > { %2445 = vmatprep.subr.bf16.mxu1 %v2727_v11 }
  0xe0   : > { %2424 = vmatpush3.bf16.msra.mxu0 %v2728_v12 }
  0xe1   : > { %2446 = vmatpush3.bf16.msra.mxu1 %v2729_v13  ;;  %2425 = vmatprep.subr.bf16.mxu0 %v2730_v14 }
  0xe2   : > { %2447 = vmatprep.subr.bf16.mxu1 %v2731_v15 }
  0xe4   : > { %2426 = vmatpush3.bf16.msra.mxu0 %v2732_v16 }
  0xe5   : > { %2448 = vmatpush3.bf16.msra.mxu1 %v2733_v17  ;;  %2473 = vmatprep.subr.bf16.mxu0 %v2940_v25 }
  0xe6   : > { %2493 = vmatprep.subr.bf16.mxu1 %v2940_v25 }
  0xe7   : > { %1708 = vmatmul.mubr.bf16.vlgmr.msra.gmra.mxu0 %v2124_v20 }
  0xe8   : > { %1748 = vmatmul.mubr.bf16.vlgmr.msra.gmra.mxu1 %v2126_v22  ;;  %2474 = vmatpush3.bf16.msra.mxu0 %v2738_v24 }
  0xe9   : > { %2475 = vmatprep.subr.bf16.mxu0 %v2940_v25  ;;  %2489 = vmatprep.mubr.msk.bf16.mxu0 %vm2941_vm0, %v2940_v25 }
  0xea   : > { %2509 = vmatprep.mubr.msk.bf16.mxu1 %vm2941_vm0, %v2940_v25  ;;  %2494 = vmatpush3.bf16.msra.mxu1 %v2746_v33 }
  0xeb   : > { %2495 = vmatprep.subr.bf16.mxu1 %v2940_v25 }
  0xec   : > { %2476 = vmatpush3.bf16.msra.mxu0 %v2739_v26 }
  0xed   : > { %2477 = vmatprep.subr.bf16.mxu0 %v2940_v25 }
  0xee   : > { %2496 = vmatpush3.bf16.msra.mxu1 %v2747_v34 }
  0xef   : > { %2497 = vmatprep.subr.bf16.mxu1 %v2940_v25 }
  0xf0   : > { %2478 = vmatpush3.bf16.msra.mxu0 %v2740_v27  ;;  %v2752_v27 = vld [vmem:[#allocation8 + $0x8] sm:$0xff]  }
  0xf1   : > { %2479 = vmatprep.subr.bf16.mxu0 %v2940_v25 }
  0xf2   : > { %2498 = vmatpush3.bf16.msra.mxu1 %v2748_v35 }
  0xf3   : > { %2499 = vmatprep.subr.bf16.mxu1 %v2940_v25 }
  0xf4   : > { %2480 = vmatpush3.bf16.msra.mxu0 %v2741_v28  ;;  %v2753_v28 = vld [vmem:[#allocation8] sm:$0xff]  }
  0xf5   : > { %2481 = vmatprep.subr.bf16.mxu0 %v2940_v25 }
  0xf6   : > { %2500 = vmatpush3.bf16.msra.mxu1 %v2749_v36 }
  0xf7   : > { %2501 = vmatprep.subr.bf16.mxu1 %v2940_v25 }
  0xf8   : > { %2482 = vmatpush3.bf16.msra.mxu0 %v2742_v29  ;;  %v2256_v29 = vld [vmem:[%s3214_s4] ss:$0 sm:$0xff] }
  0xf9   : > { %2483 = vmatprep.subr.bf16.mxu0 %v2940_v25 }
  0xfa   : > { %2502 = vmatpush3.bf16.msra.mxu1 %v2750_v37 }
  0xfb   : > { %2503 = vmatprep.subr.bf16.mxu1 %v2940_v25 }
  0xfc   : > { %2484 = vmatpush3.bf16.msra.mxu0 %v2743_v30 }
  0xfd   : > { %2485 = vmatprep.subr.bf16.mxu0 %v2940_v25 }
  0xfe   : > { %2504 = vmatpush3.bf16.msra.mxu1 %v2751_v40 }
  0xff   : > { %2505 = vmatprep.subr.bf16.mxu1 %v2940_v25 }
 0x100   : > { %2486 = vmatpush3.bf16.msra.mxu0 %v2744_v31 }
 0x101   : > { %2487 = vmatprep.subr.bf16.mxu0 %v2940_v25 }
 0x102   : > { %2506 = vmatpush3.bf16.msra.mxu1 %v2752_v27 }
 0x103   : > { %2507 = vmatprep.subr.bf16.mxu1 %v2940_v25  ;;  %v2265_v25 = vld [vmem:[%s3216_s6] ss:$0 sm:$0xff] }
 0x104   : > { %2488 = vmatpush3.bf16.msra.mxu0 %v2745_v32 }
 0x106   : > { %2508 = vmatpush3.bf16.msra.mxu1 %v2753_v28 }
 0x147   : > { %v2295_v38 = vpop.f32.mrf.mxu0 }
 0x148   : > { %v2317_v39 = vpop.f32.mrf.mxu1 }
 0x149   : > { %v2296_v42 = vpop.f32.mrf.mxu0 }
 0x14a   : > { %v2318_v43 = vpop.f32.mrf.mxu1  ;;  %v2297_v44 = vadd.f32 %v2296_v42, %v2295_v38 }
 0x14b   : > { %v2319_v45 = vadd.f32 %v2318_v43, %v2317_v39  ;;  %v2298_v46 = vpop.f32.mrf.mxu0 }
 0x14c   : > { %v2320_v47 = vpop.f32.mrf.mxu1  ;;  %v1470_v48 = vadd.f32 %v2297_v44, %v2111_v41 }
 0x14d   : > { %v2299_v49 = vpop.f32.mrf.mxu0 }
 0x14e   : > { %v2321_v50 = vpop.f32.mrf.mxu1  ;;  %v1510_v51 = vadd.f32 %v2319_v45, %v1470_v48 }
 0x167   : > { %v2339_v52 = vpop.f32.mrf.mxu0 }
 0x168   : > { %v2361_v53 = vpop.f32.mrf.mxu1 }
 0x169   : > { %v2340_v54 = vpop.f32.mrf.mxu0 }
 0x16a   : > { %v2362_v55 = vpop.f32.mrf.mxu1  ;;  %v2341_v4 = vadd.f32 %v2340_v54, %v2339_v52 }
 0x16b   : > { %v2342_v56 = vpop.f32.mrf.mxu0  ;;  %v2363_v6 = vadd.f32 %v2362_v55, %v2361_v53 }
 0x16c   : > { %v2364_v57 = vpop.f32.mrf.mxu1  ;;  %v1550_v5 = vadd.f32 %v2341_v4, %v1510_v51 }
 0x16d   : > { %v2343_v58 = vpop.f32.mrf.mxu0 }
 0x16e   : > { %v2365_v59 = vpop.f32.mrf.mxu1  ;;  %v1590_v8 = vadd.f32 %v2363_v6, %v1550_v5 }
 0x187   : > { %v2383_v60 = vpop.f32.mrf.mxu0 }
 0x188   : > { %v2405_v61 = vpop.f32.mrf.mxu1 }
 0x189   : > { %v2384_v62 = vpop.f32.mrf.mxu0 }
 0x18a   : > { %v2406_v63 = vpop.f32.mrf.mxu1  ;;  %v2385_v7 = vadd.f32 %v2384_v62, %v2383_v60 }
 0x18b   : > { %v2386_v0 = vpop.f32.mrf.mxu0  ;;  %v2407_v10 = vadd.f32 %v2406_v63, %v2405_v61 }
 0x18c   : > { %v2408_v1 = vpop.f32.mrf.mxu1  ;;  %v1630_v9 = vadd.f32 %v2385_v7, %v1590_v8 }
 0x18d   : > { %v2387_v2 = vpop.f32.mrf.mxu0 }
 0x18e   : > { %v2409_v3 = vpop.f32.mrf.mxu1  ;;  %v1670_v14 = vadd.f32 %v2407_v10, %v1630_v9 }
 0x1a7   : > { %v2427_v11 = vpop.f32.mrf.mxu0 }
 0x1a8   : > { %v2449_v12 = vpop.f32.mrf.mxu1 }
 0x1a9   : > { %v2428_v13 = vpop.f32.mrf.mxu0 }
 0x1aa   : > { %v2429_v15 = vadd.f32 %v2428_v13, %v2427_v11  ;;  %v2450_v16 = vpop.f32.mrf.mxu1 }
 0x1ab   : > { %v2430_v17 = vpop.f32.mrf.mxu0  ;;  %v2451_v19 = vadd.f32 %v2450_v16, %v2449_v12 }
 0x1ac   : > { %v1710_v18 = vadd.f32 %v2429_v15, %v1670_v14  ;;  %v2452_v20 = vpop.f32.mrf.mxu1 }
 0x1ad   : > { %v2431_v21 = vpop.f32.mrf.mxu0 }
 0x1ae   : > { %v1750_v22 = vadd.f32 %v2451_v19, %v1710_v18  ;;  %v2453_v23 = vpop.f32.mrf.mxu1 }
 0x1b0   : > { %v1755_v24 = vmax.f32 %v1750_v22, 0.0 }
 0x1b2   : > { %v1756_v26 = vpack.c.bf16 %v1755_v24, %v1755_v24 }
 0x1b4   : > { %2490 = vmatmul.mubr.bf16.vlgmr.msra.gmra.mxu0 %v1756_v26 }
 0x274   : > { %v1862_v30 = vpop.f32.mrf.mxu0 }
 0x275   : > { %v1863_v31 = vadd.f32 %v2256_v29, %v1862_v30 }
 0x276   : > { %v2491_v32 = vpop.f32.mrf.mxu0 }
 0x277   : > { %v1868_v33 = vmax.f32 %v1863_v31, 0.0 }
 0x278   : > { %v1865_v34 = vpop.f32.mrf.mxu0 }
 0x279   : > { %v1869_v35 = vpack.c.bf16 %v1868_v33, %v1868_v33 }
 0x27a   : > { %v2492_v36 = vpop.f32.mrf.mxu0 }
 0x27b   : > { %2510 = vmatmul.mubr.bf16.vlgmr.msra.gmra.mxu1 %v1869_v35 }
 0x33b   : > { %v1975_v37 = vpop.f32.mrf.mxu1 }
 0x33c   : > { %v1976_v38 = vadd.f32 %v2265_v25, %v1975_v37 }
 0x33d   : > { %v2511_v39 = vpop.f32.mrf.mxu1 }
 0x33e   : > { %v1981_v40 = vpack.c.bf16 %v1976_v38, %v1976_v38 }
 0x33f   : > { %v1978_v41 = vpop.f32.mrf.mxu1 }
 0x340   : > { %1982 = vst [vmem:[%s338_s19] sm:$0xf] %v1981_v40 }
 0x341   : > { %v2512_v42 = vpop.f32.mrf.mxu1 }
 0x342   : > { %2873 = shalt.err (!%p2870_p9)
}
 0x343   : > { %s2874_s9 = scalar_lea.hbm %s3167_s12, 64  ;;  %s2878_s10 = scalar_lea.hbm %s3217_s7, 128 }
 0x344   : > { %p2875_p13 = scmp.ne.s32.totalorder %s3167_s12, %s2874_s9  ;;  %p2879_p10 = scmp.lt.s32.totalorder %s3167_s12, %s3217_s7 }
 0x345   : > { %p2880_p11 = scmp.lt.s32.totalorder %s2878_s10, %s2874_s9 }
 0x346   : > { %p2876_p1 = pnand %p2875_p13, %p3239_p6 }
 0x347   : > { %p2881_p2 = por %p2880_p11, %p2879_p10 }
 0x348   : > { %p2877_p8 = pneg %p2876_p1 }
 0x34a   : > { %p2882_p4 = pnand %p2881_p2, %p2877_p8 }
 0x34c   : > { %2885 = shalt.err (!%p2882_p4)
}
 0x34d   : > { %2527 = dma.vmem_to_hbm [thread:$0]  (%p3239_p6), %s3169_s16, 64, %s3167_s12, %s1984_s22  }
 0x34e PF: > { %s2009_s18 = sand.u32 1, %s2920_s24   ;;  %p3240_p12 = scmp.ne.s32.totalorder %s3225_s8, 0 }
 0x34f   : > { %p3241_p0 = scmp.ge.s32.totalorder %s2932_s27, 2  ;;  %s2010_s19 = scalar_lea.sflag [#allocation4], %s2009_s18 }
 0x351   : > { %p2544_p5 = pnand %p3241_p0, %p3240_p12 }
 0x353   : > { %p2545_p3 = pneg %p2544_p5 }
 0x355   : > { %2915 = dma.done.wait (%p2545_p3), %s2010_s19, 64  }
 0x356   : > { %2917 = vsyncadd (%p2545_p3), %s2010_s19, 4294967232  ;;  %p22_p7 = scmp.ge.s32.totalorder %s3063_s14, 4   ;;  %s3242_s24 = smov %s2924_s25 }
 0x357   : > { %s3243_s25 = smov %s2928_s26  ;;  %s3244_s26 = smov %s3073_s17 }
 0x358   : > { %s3245_s27 = smov %s3063_s14  ;;  %24 = sbr.rel (!%p22_p7) target bundleno = 10 (0xa), region = 105 }
 0x35d   :  { %2015 = vsyncpa [#allocation3], 1 }
 0x35e   :  { %2017 = vsyncpa [#allocation3 + $0x1], 1 }
 0x35f   :  { %2018 = vsyncpa [#allocation6], 1 }
 0x360   :  { %2019 = vsyncpa [#allocation9], 1 }
 0x361   :  { %2020 = vsyncpa [#allocation4], 1 }
 0x362   :  { %2022 = vsyncpa [#allocation4 + $0x1], 1 }

</bundles_post_ra>
